<compile_context>
chip_gen: v6e
topology: v6e:2x2x1
jax: 0.10.0
libtpu: 0.0.40
codegen_flags: <defaults>
</compile_context>

<pallas_src>
import functools

import jax
import jax.numpy as jnp
from jax import lax
from jax.experimental import pallas as pl
from jax.experimental.pallas import tpu as pltpu

_MiB = 1024 * 1024


# ----------------------------------------------------------------------------
# Kernel: one MXU matmul (moving average via band matrix) + one VPU subtract.
# ----------------------------------------------------------------------------
def _decomp_kernel(x_ref, res_ref, mean_ref, *, kernel_size, seq_len, t_on_lanes):
    """x_ref: 2-D view of the batch.

    t_on_lanes=True : x is (B*D, T), mean = x @ W with W[s, t] = A[t, s]
    t_on_lanes=False: x is (T, B*D), mean = A @ x
    where A[t, s] is the replicate-padded k-tap moving-average band matrix.
    """
    k = kernel_size
    t = seq_len
    p = (k - 1) // 2

    # Build the band matrix in-kernel from iota masks (constant-folds, no HBM
    # operand).  Interior columns get weight 1/k inside the band; the first and
    # last columns additionally carry the duplicated edge weights coming from
    # PyTorch's replicate padding.
    rr = lax.broadcasted_iota(jnp.int32, (t, t), 0)
    cc = lax.broadcasted_iota(jnp.int32, (t, t), 1)
    band = (jnp.abs(rr - cc) <= p).astype(jnp.float32)
    if t_on_lanes:
        # W[s, t'] = A[t', s]: rows index the contraction axis s, cols index t'.
        edge_lo = jnp.where(rr == 0, jnp.clip(p - cc, 0, p), 0)
        edge_hi = jnp.where(rr == t - 1, jnp.clip(cc + p - (t - 1), 0, p), 0)
    else:
        # A[t', s]: rows index t', cols index the contraction axis s.
        edge_lo = jnp.where(cc == 0, jnp.clip(p - rr, 0, p), 0)
        edge_hi = jnp.where(cc == t - 1, jnp.clip(rr + p - (t - 1), 0, p), 0)
    w = (band + edge_lo.astype(jnp.float32) + edge_hi.astype(jnp.float32)) * (
        1.0 / float(k))

    x = x_ref[...].astype(jnp.float32)
    if t_on_lanes:
        mean = jnp.dot(x, w, preferred_element_type=jnp.float32)
    else:
        mean = jnp.dot(w, x, preferred_element_type=jnp.float32)

    mean_ref[...] = mean.astype(mean_ref.dtype)
    res_ref[...] = (x - mean).astype(res_ref.dtype)


def _decomp_2d(x2, kernel_size, t_on_lanes, seq_len):
    rows, cols = x2.shape
    itemsize = jnp.dtype(x2.dtype).itemsize
    n = rows * cols

    # VMEM footprint estimate: in + 2 out buffers, f32 copies of x and mean,
    # plus the (T, T) f32 band matrix.
    vmem_bytes = 3 * n * itemsize + 2 * n * 4 + seq_len * seq_len * 4
    if vmem_bytes > 48 * _MiB:
        # TODO(synk): add a banded (tq, tk)-tiled / k-tap roll+add fallback for
        # long sequences instead of the whole-resident O(T^2) band matmul.
        raise ValueError(
            "series_decomp: whole-sequence VMEM-resident kernel needs "
            f"~{vmem_bytes / _MiB:.1f} MiB VMEM, which exceeds the safe budget "
            "(v7x has 64 MiB physical VMEM).")
    compiler_params = None
    if vmem_bytes > 12 * _MiB:
        compiler_params = pltpu.CompilerParams(
            vmem_limit_bytes=int(min(64 * _MiB, 2 * vmem_bytes)))

    flops = 2 * rows * cols * seq_len + n            # band matmul + subtract
    bytes_accessed = 3 * n * itemsize                # x in, res + mean out

    kernel = functools.partial(_decomp_kernel, kernel_size=kernel_size,
                               seq_len=seq_len, t_on_lanes=t_on_lanes)
    return pl.pallas_call(
        kernel,
        out_shape=(jax.ShapeDtypeStruct((rows, cols), x2.dtype),
                   jax.ShapeDtypeStruct((rows, cols), x2.dtype)),
        in_specs=[pl.BlockSpec(memory_space=pltpu.MemorySpace.VMEM)],
        out_specs=(pl.BlockSpec(memory_space=pltpu.MemorySpace.VMEM),
                   pl.BlockSpec(memory_space=pltpu.MemorySpace.VMEM)),
        cost_estimate=pl.CostEstimate(flops=int(flops), transcendentals=0,
                                      bytes_accessed=int(bytes_accessed)),
        compiler_params=compiler_params,
    )(x2)


@functools.partial(jax.jit, static_argnums=(1,))
def series_decomp(x, kernel_size):
    """x: (B, T, D) -> (res, moving_mean), each (B, T, D)."""
    if kernel_size % 2 != 1:
        # PyTorch's (k-1)//2 symmetric replicate pad only yields a length-T
        # moving mean (and thus a valid x - mean) for odd kernel_size.
        raise ValueError("series_decomp requires an odd kernel_size")
    B, T, D = x.shape

    # Orientation choice: put the longer axis on lanes for denser (unmasked)
    # vector stores.  Pure layout plumbing in the wrapper.
    t_on_lanes = T >= B * D
    if t_on_lanes:
        x2 = jnp.transpose(x, (0, 2, 1)).reshape(B * D, T)     # lanes = T
    else:
        x2 = jnp.transpose(x, (1, 0, 2)).reshape(T, B * D)     # lanes = B*D

    res2, mean2 = _decomp_2d(x2, kernel_size, t_on_lanes, T)

    if t_on_lanes:
        res = jnp.transpose(res2.reshape(B, D, T), (0, 2, 1))
        mean = jnp.transpose(mean2.reshape(B, D, T), (0, 2, 1))
    else:
        res = jnp.transpose(res2.reshape(T, B, D), (1, 0, 2))
        mean = jnp.transpose(mean2.reshape(T, B, D), (1, 0, 2))
    return res, mean


# ----------------------------------------------------------------------------
# Pure-JAX reference (mirrors the PyTorch module exactly) for correctness.
# ----------------------------------------------------------------------------
def ref_series_decomp(x, kernel_size):
    p = (kernel_size - 1) // 2
    front = jnp.repeat(x[:, :1, :], p, axis=1)
    end = jnp.repeat(x[:, -1:, :], p, axis=1)
    xp = jnp.concatenate([front, x, end], axis=1)          # (B, T+2p, D)
    T = x.shape[1]
    mean = sum(xp[:, j:j + T, :] for j in range(kernel_size)) / kernel_size
    return x - mean, mean


# ----------------------------------------------------------------------------
# Deterministic run + check
# ----------------------------------------------------------------------------
if __name__ == "__main__":
    key = jax.random.PRNGKey(0)

    # (B, T, d_model, moving_avg kernel) — small configs consistent with the
    # MobiMixer usage of series_decomp.
    configs = [(2, 16, 32, 5), (2, 96, 32, 25)]

    for i, (B, T, D, k) in enumerate(configs):
        kx = jax.random.fold_in(key, i)
        x = jax.random.normal(kx, (B, T, D), jnp.float32)

        res, mean = series_decomp(x, k)
        res = jax.block_until_ready(res)
        mean = jax.block_until_ready(mean)

        r_res, r_mean = ref_series_decomp(x, k)
        assert res.shape == (B, T, D), res.shape
        assert mean.shape == (B, T, D), mean.shape
        tol = max(1e-5, 1e-6 * k)   # k-scaled tolerance (summation-order drift)
        assert jnp.allclose(mean, r_mean, atol=tol, rtol=tol), \
            float(jnp.max(jnp.abs(mean - r_mean)))
        assert jnp.allclose(res, r_res, atol=tol, rtol=tol), \
            float(jnp.max(jnp.abs(res - r_res)))

    print("KERNEL_OK")
</pallas_src>

<mosaic_0001>
module attributes {stable_mosaic.version = 11 : i64} {
  func.func @_decomp_kernel(%arg0: memref<16x64xf32, #tpu.memory_space<vmem>>, %arg1: memref<16x64xf32, #tpu.memory_space<vmem>>, %arg2: memref<16x64xf32, #tpu.memory_space<vmem>>) attributes {dimension_semantics = [], scalar_prefetch = 0 : i64, scratch_operands = 0 : i64, tpu.core_type = #tpu.core_type<tc>} {
    %0 = tpu.iota {dimensions = array<i32: 0>} : vector<16x16xi32>
    %1 = tpu.iota {dimensions = array<i32: 1>} : vector<16x16xi32>
    %2 = arith.subi %0, %1 : vector<16x16xi32>
    %3 = math.absi %2 : vector<16x16xi32>
    %c2_i32 = arith.constant 2 : i32
    %4 = vector.broadcast %c2_i32 : i32 to vector<16x16xi32>
    %5 = arith.cmpi sle, %3, %4 : vector<16x16xi32>
    %6 = arith.extui %5 : vector<16x16xi1> to vector<16x16xi32>
    %7 = arith.sitofp %6 : vector<16x16xi32> to vector<16x16xf32>
    %c0_i32 = arith.constant 0 : i32
    %8 = vector.broadcast %c0_i32 : i32 to vector<16x16xi32>
    %9 = arith.cmpi eq, %1, %8 : vector<16x16xi32>
    %c2_i32_0 = arith.constant 2 : i32
    %10 = vector.broadcast %c2_i32_0 : i32 to vector<16x16xi32>
    %11 = arith.subi %10, %0 : vector<16x16xi32>
    %c0_i32_1 = arith.constant 0 : i32
    %c2_i32_2 = arith.constant 2 : i32
    %12 = vector.broadcast %c0_i32_1 : i32 to vector<16x16xi32>
    %13 = arith.maxsi %12, %11 : vector<16x16xi32>
    %14 = vector.broadcast %c2_i32_2 : i32 to vector<16x16xi32>
    %15 = arith.minsi %14, %13 : vector<16x16xi32>
    %c0_i32_3 = arith.constant 0 : i32
    %16 = vector.broadcast %c0_i32_3 : i32 to vector<16x16xi32>
    %17 = arith.select %9, %15, %16 : vector<16x16xi1>, vector<16x16xi32>
    %c15_i32 = arith.constant 15 : i32
    %18 = vector.broadcast %c15_i32 : i32 to vector<16x16xi32>
    %19 = arith.cmpi eq, %1, %18 : vector<16x16xi32>
    %c2_i32_4 = arith.constant 2 : i32
    %20 = vector.broadcast %c2_i32_4 : i32 to vector<16x16xi32>
    %21 = arith.addi %0, %20 : vector<16x16xi32>
    %c15_i32_5 = arith.constant 15 : i32
    %22 = vector.broadcast %c15_i32_5 : i32 to vector<16x16xi32>
    %23 = arith.subi %21, %22 : vector<16x16xi32>
    %c0_i32_6 = arith.constant 0 : i32
    %c2_i32_7 = arith.constant 2 : i32
    %24 = vector.broadcast %c0_i32_6 : i32 to vector<16x16xi32>
    %25 = arith.maxsi %24, %23 : vector<16x16xi32>
    %26 = vector.broadcast %c2_i32_7 : i32 to vector<16x16xi32>
    %27 = arith.minsi %26, %25 : vector<16x16xi32>
    %c0_i32_8 = arith.constant 0 : i32
    %28 = vector.broadcast %c0_i32_8 : i32 to vector<16x16xi32>
    %29 = arith.select %19, %27, %28 : vector<16x16xi1>, vector<16x16xi32>
    %30 = arith.sitofp %17 : vector<16x16xi32> to vector<16x16xf32>
    %31 = arith.addf %7, %30 : vector<16x16xf32>
    %32 = arith.sitofp %29 : vector<16x16xi32> to vector<16x16xf32>
    %33 = arith.addf %31, %32 : vector<16x16xf32>
    %cst = arith.constant 2.000000e-01 : f32
    %34 = vector.broadcast %cst : f32 to vector<16x16xf32>
    %35 = arith.mulf %33, %34 : vector<16x16xf32>
    %c0 = arith.constant 0 : index
    %c0_9 = arith.constant 0 : index
    %36 = vector.load %arg0[%c0, %c0_9] : memref<16x64xf32, #tpu.memory_space<vmem>>, vector<16x64xf32>
    %cst_10 = arith.constant dense<0.000000e+00> : vector<16x64xf32>
    %37 = tpu.matmul %35, %36, %cst_10 {dimension_numbers = #tpu.dot_dimension_numbers<[1], [0], [0], [1], [0, 0, 1, 1], [], []>} : vector<16x16xf32>, vector<16x64xf32>, vector<16x64xf32> -> vector<16x64xf32>
    %c0_11 = arith.constant 0 : index
    %c0_12 = arith.constant 0 : index
    %38 = vector.load %arg2[%c0_11, %c0_12] : memref<16x64xf32, #tpu.memory_space<vmem>>, vector<16x64xf32>
    tpu.vector_store %arg2[%c0_11, %c0_12], %37 {strides = array<i32>} : memref<16x64xf32, #tpu.memory_space<vmem>>, vector<16x64xf32>,
    %39 = arith.subf %36, %37 : vector<16x64xf32>
    %c0_13 = arith.constant 0 : index
    %c0_14 = arith.constant 0 : index
    %40 = vector.load %arg1[%c0_13, %c0_14] : memref<16x64xf32, #tpu.memory_space<vmem>>, vector<16x64xf32>
    tpu.vector_store %arg1[%c0_13, %c0_14], %39 {strides = array<i32>} : memref<16x64xf32, #tpu.memory_space<vmem>>, vector<16x64xf32>,
    return
  }
}

</mosaic_0001>

<bundles_post_ra>
// kernel: series_decomp.1
= control target key start
LH: loop header
LB: loop body
LE: loop exit
PB: predicated region body
PF: predicated region fallthrough
CT: control target
= control target key end

     0   :  { %v10_v0 = vlaneseq  ;;  %v190_v18 = vmov 0.0   ;;  %vm69_vm8 = vcmask 130048   ;;  %vm151_vm9 = vcmask 523264   ;;  %s224_s0 = inlined_call_operand.vmem [shape: f32[16,64], index: 0, kind: input, shape index: {}]   ;;  %s225_s2 = inlined_call_operand.vmem [shape: f32[16,64], index: 2, kind: output, shape index: {1}]   ;;  %s226_s1 = inlined_call_operand.vmem [shape: f32[16,64], index: 1, kind: output, shape index: {0}]  }
   0x1   :  { %v68_v1 = vld [vmem:[%s224_s0 + $0x8] sm:$0xff]  ;;  %v67_v2 = vld [vmem:[%s224_s0] sm:$0xff] }
   0x2   :  { %182 = vmatprep.subr.mxu0 %v68_v1  ;;  %v11_v3 = vshrl.u32 %v10_v0, 7  ;;  %v14_v4 = vand.u32 127, %v10_v0 }
   0x3   :  { %183 = vmatpush3.msra.mxu0 %v68_v1 }
   0x4   :  { %184 = vmatprep.subr.mxu0 %v67_v2  ;;  %v12_v5 = vadd.s32 8, %v11_v3  ;;  %v15_v6 = vsub.s32 %v11_v3, %v14_v4  ;;  %v30_v7 = vsub.s32 2, %v11_v3  ;;  %vm29_vm2 = vcmp.eq.s32.totalorder %v14_v4, 0 }
   0x5   :  { %185 = vmatpush3.msra.mxu0 %v67_v2  ;;  %vm42_vm7 = vcmp.eq.s32.totalorder %v14_v4, 15 }
   0x6   :  { %v16_v8 = vsub.s32 %v12_v5, %v14_v4  ;;  %v18_v9 = vsub.s32 0, %v15_v6  ;;  %vm32_vm0 = vcmp.gt.s32.totalorder %v30_v7, 0  ;;  %v44_v10 = vadd.s32 2, %v12_v5 }
   0x7   :  { %v33_v11 = vsel %vm32_vm0, %v30_v7, 0 }
   0x8   :  { %v166_v12 = vmin.u32 %v18_v9, %v15_v6  ;;  %v21_v13 = vsub.s32 0, %v16_v8  ;;  %vm36_vm1 = vcmp.lt.s32.totalorder %v33_v11, 2  ;;  %v171_v14 = vadd.s32 4294967281, %v44_v10 }
   0x9   :  { %v37_v15 = vsel %vm36_vm1, %v33_v11, 2 }
   0xa   :  { %v167_v16 = vmin.u32 %v21_v13, %v16_v8  ;;  %vm23_vm3 = vcmp.le.s32.totalorder %v166_v12, 2  ;;  %vm49_vm4 = vcmp.gt.s32.totalorder %v171_v14, 0  ;;  %v172_v17 = vcvt.s32.f32 %v37_v15 }
   0xb   :  { %v168_v19 = vsel %vm23_vm3, 1.0, %v190_v18  ;;  %v50_v20 = vsel %vm49_vm4, %v171_v14, 0 }
   0xc   :  { %vm24_vm5 = vcmp.le.s32.totalorder %v167_v16, 2  ;;  %vm53_vm6 = vcmp.lt.s32.totalorder %v50_v20, 2  ;;  %v173_v21 = vsel %vm29_vm2, %v172_v17, 0.0 }
   0xd   :  { %v54_v22 = vsel %vm53_vm6, %v50_v20, 2  ;;  %v59_v23 = vadd.f32 %v173_v21, %v168_v19  ;;  %v169_v24 = vsel %vm24_vm5, 1.0, %v190_v18 }
   0xe   :  { %v174_v25 = vcvt.s32.f32 %v54_v22 }
   0xf   :  { %v65_v26 = vmul.f32 0.2, %v59_v23 }
  0x10   :  { %v175_v27 = vsel %vm42_vm7, %v174_v25, 0.0 }
  0x11   :  { %v64_v28 = vadd.f32 %v175_v27, %v169_v24  ;;  %186 = vmatprep.mubr.msk.f32.mxu0 %vm69_vm8, %v65_v26 }
  0x13   :  { %v66_v29 = vmul.f32 0.2, %v64_v28 }
  0x15   :  { %187 = vmatmul.mubr.msk.f32.vlgmr.msra.gmra.mxu0 %vm69_vm8, %v66_v29 }
  0xd5   :  { %v188_v30 = vpop.f32.mrf.mxu0 }
  0xd6   :  { %153 = vst.msk [vmem:[%s225_s2 + $0x8] sm:$0xff] %vm151_vm9, %v188_v30  ;;  %v155_v31 = vsub.f32 %v68_v1, %v188_v30 }
  0xd7   :  { %v142_v32 = vpop.f32.mrf.mxu0 }
  0xd8   :  { %157 = vst.msk [vmem:[%s226_s1 + $0x8] sm:$0xff] %vm151_vm9, %v155_v31  ;;  %152 = vst.msk [vmem:[%s225_s2] sm:$0xff] %vm151_vm9, %v142_v32  ;;  %v154_v33 = vsub.f32 %v67_v2, %v142_v32 }
  0xda   :  { %156 = vst.msk [vmem:[%s226_s1] sm:$0xff] %vm151_vm9, %v154_v33 }

</bundles_post_ra>
